<compile_context>
chip_gen: v6e
topology: v6e:2x2x1
jax: 0.10.0
libtpu: 0.0.40
codegen_flags: <defaults>
</compile_context>

<pallas_src>
import jax
import jax.numpy as jnp
from jax import lax
from jax.experimental import pallas as pl
from jax.experimental.pallas import tpu as pltpu


def _round_up(x, m):
    return (x + m - 1) // m * m


def _vmem_limit_bytes():
    """Per-generation scoped-VMEM budget with headroom (v7x: 64 MiB/TC, else 128 MiB)."""
    cap = 128 * 1024 * 1024
    try:
        info = pltpu.get_tpu_info()
        cap = getattr(info, "vmem_capacity_bytes", cap) or cap
    except Exception:
        pass
    return 48 * 1024 * 1024 if cap <= 64 * 1024 * 1024 else 64 * 1024 * 1024


# --------------------------------------------------------------------------------------
# Pass 1: conv (single stacked-tap bf16 matmul, f32 accumulation) + batch statistics
# --------------------------------------------------------------------------------------
def _conv_stats_kernel(x_ref, w_ref, conv_ref, sum_ref, sq_ref):
    t = pl.program_id(1)  # inner ("arbitrary") axis: stats accumulators are resident

    # (C_out, K*C_in) @ (K*C_in, TILE1) -> (C_out, TILE1): one MXU push per tile.
    conv = jnp.dot(w_ref[...], x_ref[...], preferred_element_type=jnp.float32)
    conv_ref[...] = conv.astype(conv_ref.dtype)  # bf16 intermediate

    @pl.when(t == 0)
    def _():
        sum_ref[...] = jnp.zeros_like(sum_ref)
        sq_ref[...] = jnp.zeros_like(sq_ref)

    # No bias, zero-padded columns -> padded columns contribute exactly 0: no mask.
    sum_ref[...] += jnp.sum(conv, axis=1, keepdims=True)
    sq_ref[...] += jnp.sum(conv * conv, axis=1, keepdims=True)


# --------------------------------------------------------------------------------------
# Pass 2: folded BN (precomputed scale/shift) + PReLU, lane-dense, NCL output layout
# --------------------------------------------------------------------------------------
def _bn_prelu_kernel(conv_ref, scale_ref, shift_ref, alpha_ref, o_ref):
    y = conv_ref[...].astype(jnp.float32) * scale_ref[...] + shift_ref[...]
    o_ref[...] = jnp.where(y > 0.0, y, alpha_ref[...] * y)


# --------------------------------------------------------------------------------------
# Wrapper
# --------------------------------------------------------------------------------------
def conv_batch_chomp_relu(x, weight, bias, gamma, beta, alpha, *,
                          kernel_size, stride, dilation, padding, eps=1e-5):
    """x: (N, C_in, L) float32. Returns (N, C_out, L_out_after_chomp) float32."""
    N, C_in, L = x.shape
    C_out = weight.shape[0]
    K = kernel_size
    assert padding % 2 == 0, "symmetric chomp requires even padding"

    x = x.astype(jnp.float32)
    x_pad = jnp.pad(x, ((0, 0), (0, 0), (padding, padding)))
    L_pad = L + 2 * padding
    L_conv = (L_pad - dilation * (K - 1) - 1) // stride + 1
    L_chomp = L_conv - padding
    chomp_lo = padding // 2
    KC = K * C_in

    vmem_limit = _vmem_limit_bytes()

    # ---- per-batch padded column width (lane-aligned) and pass-2 tile width ----------
    L_cpad = _round_up(L_conv, 128)
    m = L_cpad // 128
    tl2_cap = max(128, (vmem_limit // 2) // (12 * C_out) // 128 * 128)
    TL2 = 128
    for d in range(m, 0, -1):          # largest 128-multiple divisor of L_cpad <= budget
        if m % d == 0 and 128 * d <= tl2_cap:
            TL2 = 128 * d
            break
    blocks_per_batch = L_cpad // TL2

    # ---- pass-1 lane tile: as big as the VMEM budget allows (multiple of TL2) --------
    total = N * L_cpad
    budget_cols = max(TL2, (vmem_limit // 2) // (4 * (KC + C_out)))
    TILE1 = max(TL2, min(budget_cols, total) // TL2 * TL2)
    NLp = _round_up(total, 2 * TILE1)          # even #tiles -> 2-way core split on v7x
    T_half = NLp // TILE1 // 2

    # ---- im2col (layout plumbing): taps on the contraction axis, (n, l) on lanes -----
    # TODO(synk): for very large C_in the K-fold tap replication could be replaced by an
    #             in-kernel halo load (manual DMA) to cut input HBM reads ~K x.
    taps = []
    for k in range(K):
        lo = k * dilation
        hi = lo + (L_conv - 1) * stride + 1
        taps.append(lax.slice(x_pad, (0, 0, lo), (N, C_in, hi), (1, 1, stride)))
    x_stack = jnp.concatenate(taps, axis=1)                          # (N, K*C_in, L_conv)
    x_stack = jnp.pad(x_stack, ((0, 0), (0, 0), (0, L_cpad - L_conv)))
    x_cols = jnp.transpose(x_stack, (1, 0, 2)).reshape(KC, total)    # (K*C_in, N*L_cpad)
    x_cols = jnp.pad(x_cols, ((0, 0), (0, NLp - total))).astype(jnp.bfloat16)

    # stacked conv weight: w2[co, k*C_in + ci] = weight[co, ci, k]   (bf16 MXU inputs)
    w2 = jnp.transpose(weight, (0, 2, 1)).reshape(C_out, KC).astype(jnp.bfloat16)
    # conv bias intentionally unused: it cancels exactly through train-mode BN.
    del bias

    # ---- pass 1: conv + per-core batch stats -----------------------------------------
    conv_cols, ch_sum, ch_sq = pl.pallas_call(
        _conv_stats_kernel,
        grid=(2, T_half),
        in_specs=[
            pl.BlockSpec((KC, TILE1), lambda c, t: (0, c * T_half + t)),
            pl.BlockSpec((C_out, KC), lambda c, t: (0, 0)),
        ],
        out_specs=(
            pl.BlockSpec((C_out, TILE1), lambda c, t: (0, c * T_half + t)),
            pl.BlockSpec((None, C_out, 1), lambda c, t: (c, 0, 0)),
            pl.BlockSpec((None, C_out, 1), lambda c, t: (c, 0, 0)),
        ),
        out_shape=(
            jax.ShapeDtypeStruct((C_out, NLp), jnp.bfloat16),
            jax.ShapeDtypeStruct((2, C_out, 1), jnp.float32),
            jax.ShapeDtypeStruct((2, C_out, 1), jnp.float32),
        ),
        compiler_params=pltpu.CompilerParams(
            dimension_semantics=("parallel", "arbitrary"),
            vmem_limit_bytes=vmem_limit),
        cost_estimate=pl.CostEstimate(
            flops=2 * C_out * KC * NLp + 4 * C_out * NLp,
            transcendentals=0,
            bytes_accessed=2 * (KC * NLp + C_out * NLp + C_out * KC) + 16 * C_out),
    )(x_cols, w2)

    # ---- fold BN into a per-channel scale/shift once (tiny XLA op, f32) --------------
    count = float(N * L_conv)
    s = jnp.sum(ch_sum, axis=0)                       # (C_out, 1)
    sq = jnp.sum(ch_sq, axis=0)
    mean = s / count
    var = jnp.maximum(sq / count - mean * mean, 0.0)  # biased (train-mode) variance
    scale = gamma.reshape(C_out, 1).astype(jnp.float32) * lax.rsqrt(var + eps)
    shift = beta.reshape(C_out, 1).astype(jnp.float32) - mean * scale
    a_col = alpha.reshape(C_out, 1).astype(jnp.float32)

    # ---- pass 2: scale/shift + PReLU, output directly in (N, C_out, L_cpad) ----------
    small = pl.BlockSpec((C_out, 1), lambda n, lt: (0, 0))
    y_full = pl.pallas_call(
        _bn_prelu_kernel,
        grid=(N, blocks_per_batch),
        in_specs=[
            pl.BlockSpec((C_out, TL2), lambda n, lt: (0, n * blocks_per_batch + lt)),
            small, small, small],
        out_specs=pl.BlockSpec((None, C_out, TL2), lambda n, lt: (n, 0, lt)),
        out_shape=jax.ShapeDtypeStruct((N, C_out, L_cpad), jnp.float32),
        compiler_params=pltpu.CompilerParams(
            dimension_semantics=("parallel", "parallel"),
            vmem_limit_bytes=vmem_limit),
        cost_estimate=pl.CostEstimate(
            flops=4 * C_out * N * L_cpad,
            transcendentals=0,
            bytes_accessed=6 * C_out * N * L_cpad + 12 * C_out),
    )(conv_cols, scale, shift, a_col)

    # ---- symmetric chomp: contiguous last-dim slice (already NCL layout) -------------
    return y_full[:, :, chomp_lo:chomp_lo + L_chomp]


# TODO(synk): BatchNorm running_mean/running_var momentum updates are not produced
#             (forward-only parity with train-mode normalization); the ReLU variant of
#             the module is the alpha=0 special case of the PReLU path.


def _reference(x, weight, bias, gamma, beta, alpha, *,
               kernel_size, stride, dilation, padding, eps=1e-5):
    """Pure-JAX f32 reference of the PyTorch forward (train-mode BN)."""
    conv = lax.conv_general_dilated(
        x, weight,
        window_strides=(stride,), padding=[(padding, padding)],
        rhs_dilation=(dilation,),
        dimension_numbers=("NCH", "OIH", "NCH"),
    ) + bias[None, :, None]
    mean = conv.mean(axis=(0, 2), keepdims=True)
    var = ((conv - mean) ** 2).mean(axis=(0, 2), keepdims=True)
    y = (conv - mean) / jnp.sqrt(var + eps) * gamma[None, :, None] + beta[None, :, None]
    if padding > 0:
        y = y[:, :, padding // 2: -(padding // 2)]
    return jnp.where(y > 0, y, alpha[None, :, None] * y)


if __name__ == "__main__":
    # module hyper-params (small, TCN-style): dilated conv with symmetric chomp
    n_inputs, n_outputs = 4, 8
    kernel_size, stride, dilation = 3, 1, 1
    padding = dilation * (kernel_size - 1)          # = 2, even -> symmetric chomp OK
    N, L = 2, 16

    key = jax.random.PRNGKey(0)
    kx, kw, kb = jax.random.split(key, 3)
    x = jax.random.normal(kx, (N, n_inputs, L), dtype=jnp.float32)

    # deterministic parameter init (shapes match nn.Conv1d / BatchNorm1d / PReLU)
    weight = 0.1 * jax.random.normal(kw, (n_outputs, n_inputs, kernel_size), dtype=jnp.float32)
    bias = 0.1 * jax.random.normal(kb, (n_outputs,), dtype=jnp.float32)
    gamma = jnp.ones((n_outputs,), jnp.float32)        # BN weight
    beta = jnp.zeros((n_outputs,), jnp.float32)        # BN bias
    alpha = jnp.full((n_outputs,), 0.25, jnp.float32)  # PReLU default init

    out = conv_batch_chomp_relu(
        x, weight, bias, gamma, beta, alpha,
        kernel_size=kernel_size, stride=stride, dilation=dilation, padding=padding,
    )
    out = jax.block_until_ready(out)

    ref = _reference(
        x, weight, bias, gamma, beta, alpha,
        kernel_size=kernel_size, stride=stride, dilation=dilation, padding=padding,
    )
    assert out.shape == (N, n_outputs, L), out.shape
    # bf16 matmul inputs + bf16 conv intermediate (f32 stats / BN math) -> ~1e-2 level
    # deviation from the pure-f32 reference after normalization.
    assert jnp.allclose(out, ref, atol=5e-2, rtol=5e-2), float(jnp.max(jnp.abs(out - ref)))

    print("KERNEL_OK")
</pallas_src>

<mosaic_0001>
module attributes {stable_mosaic.version = 11 : i64} {
  func.func @_conv_stats_kernel(%arg0: i32, %arg1: i32, %arg2: memref<12x256xbf16, #tpu.memory_space<vmem>>, %arg3: memref<8x12xbf16, #tpu.memory_space<vmem>>, %arg4: memref<8x256xbf16, #tpu.memory_space<vmem>>, %arg5: memref<1x8x1xf32, #tpu.memory_space<vmem>>, %arg6: memref<1x8x1xf32, #tpu.memory_space<vmem>>) attributes {dimension_semantics = [#tpu.dimension_semantics<parallel>, #tpu.dimension_semantics<arbitrary>], iteration_bounds = array<i64: 2, 1>, scalar_prefetch = 0 : i64, scratch_operands = 0 : i64, tpu.core_type = #tpu.core_type<tc>, window_params = [{transform_indices = @transform_0, window_bounds = array<i64: 12, 256>}, {pipeline_mode = #tpu.pipeline_mode<synchronous>, transform_indices = @transform_1, window_bounds = array<i64: 8, 12>}, {transform_indices = @transform_2, window_bounds = array<i64: 8, 256>}, {transform_indices = @transform_3, window_bounds = array<i64: 1, 8, 1>}, {transform_indices = @transform_4, window_bounds = array<i64: 1, 8, 1>}]} {
    %c0 = arith.constant 0 : index
    %c0_0 = arith.constant 0 : index
    %0 = vector.load %arg3[%c0, %c0_0] : memref<8x12xbf16, #tpu.memory_space<vmem>>, vector<8x12xbf16>
    %c0_1 = arith.constant 0 : index
    %c0_2 = arith.constant 0 : index
    %1 = vector.load %arg2[%c0_1, %c0_2] : memref<12x256xbf16, #tpu.memory_space<vmem>>, vector<12x256xbf16>
    %cst = arith.constant dense<0.000000e+00> : vector<8x256xf32>
    %2 = tpu.matmul %0, %1, %cst {dimension_numbers = #tpu.dot_dimension_numbers<[1], [0], [0], [1], [0, 0, 1, 1], [], []>} : vector<8x12xbf16>, vector<12x256xbf16>, vector<8x256xf32> -> vector<8x256xf32>
    %3 = arith.truncf %2 : vector<8x256xf32> to vector<8x256xbf16>
    %c0_3 = arith.constant 0 : index
    %c0_4 = arith.constant 0 : index
    %4 = vector.load %arg4[%c0_3, %c0_4] : memref<8x256xbf16, #tpu.memory_space<vmem>>, vector<8x256xbf16>
    tpu.vector_store %arg4[%c0_3, %c0_4], %3 {strides = array<i32>} : memref<8x256xbf16, #tpu.memory_space<vmem>>, vector<8x256xbf16>,
    %c0_i32 = arith.constant 0 : i32
    %5 = arith.cmpi eq, %arg1, %c0_i32 : i32
    %6 = arith.extui %5 : i1 to i32
    %c0_i32_5 = arith.constant 0 : i32
    %7 = arith.cmpi ne, %6, %c0_i32_5 : i32
    scf.if %7 {
      %cst_20 = arith.constant 0.000000e+00 : f32
      %25 = vector.broadcast %cst_20 : f32 to vector<8x1xf32>
      %c0_21 = arith.constant 0 : index
      %c0_22 = arith.constant 0 : index
      %c0_23 = arith.constant 0 : index
      %26 = vector.load %arg5[%c0_21, %c0_22, %c0_23] : memref<1x8x1xf32, #tpu.memory_space<vmem>>, vector<1x8x1xf32>
      %27 = vector.shape_cast %26 : vector<1x8x1xf32> to vector<8x1xf32>
      %28 = vector.shape_cast %25 : vector<8x1xf32> to vector<1x8x1xf32>
      tpu.vector_store %arg5[%c0_21, %c0_22, %c0_23], %28 {strides = array<i32>} : memref<1x8x1xf32, #tpu.memory_space<vmem>>, vector<1x8x1xf32>,
      %cst_24 = arith.constant 0.000000e+00 : f32
      %29 = vector.broadcast %cst_24 : f32 to vector<8x1xf32>
      %c0_25 = arith.constant 0 : index
      %c0_26 = arith.constant 0 : index
      %c0_27 = arith.constant 0 : index
      %30 = vector.load %arg6[%c0_25, %c0_26, %c0_27] : memref<1x8x1xf32, #tpu.memory_space<vmem>>, vector<1x8x1xf32>
      %31 = vector.shape_cast %30 : vector<1x8x1xf32> to vector<8x1xf32>
      %32 = vector.shape_cast %29 : vector<8x1xf32> to vector<1x8x1xf32>
      tpu.vector_store %arg6[%c0_25, %c0_26, %c0_27], %32 {strides = array<i32>} : memref<1x8x1xf32, #tpu.memory_space<vmem>>, vector<1x8x1xf32>,
    } else {
    }
    %c0_6 = arith.constant 0 : index
    %c0_7 = arith.constant 0 : index
    %c0_8 = arith.constant 0 : index
    %8 = vector.load %arg5[%c0_6, %c0_7, %c0_8] : memref<1x8x1xf32, #tpu.memory_space<vmem>>, vector<1x8x1xf32>
    %9 = vector.shape_cast %8 : vector<1x8x1xf32> to vector<8x1xf32>
    %cst_9 = arith.constant dense<0.000000e+00> : vector<8xf32>
    %10 = vector.multi_reduction <add>, %2, %cst_9 [1] : vector<8x256xf32> to vector<8xf32>
    %11 = vector.shape_cast %10 : vector<8xf32> to vector<8x1xf32>
    %12 = arith.addf %9, %11 : vector<8x1xf32>
    %c0_10 = arith.constant 0 : index
    %c0_11 = arith.constant 0 : index
    %c0_12 = arith.constant 0 : index
    %13 = vector.load %arg5[%c0_10, %c0_11, %c0_12] : memref<1x8x1xf32, #tpu.memory_space<vmem>>, vector<1x8x1xf32>
    %14 = vector.shape_cast %13 : vector<1x8x1xf32> to vector<8x1xf32>
    %15 = vector.shape_cast %12 : vector<8x1xf32> to vector<1x8x1xf32>
    tpu.vector_store %arg5[%c0_10, %c0_11, %c0_12], %15 {strides = array<i32>} : memref<1x8x1xf32, #tpu.memory_space<vmem>>, vector<1x8x1xf32>,
    %c0_13 = arith.constant 0 : index
    %c0_14 = arith.constant 0 : index
    %c0_15 = arith.constant 0 : index
    %16 = vector.load %arg6[%c0_13, %c0_14, %c0_15] : memref<1x8x1xf32, #tpu.memory_space<vmem>>, vector<1x8x1xf32>
    %17 = vector.shape_cast %16 : vector<1x8x1xf32> to vector<8x1xf32>
    %18 = arith.mulf %2, %2 : vector<8x256xf32>
    %cst_16 = arith.constant dense<0.000000e+00> : vector<8xf32>
    %19 = vector.multi_reduction <add>, %18, %cst_16 [1] : vector<8x256xf32> to vector<8xf32>
    %20 = vector.shape_cast %19 : vector<8xf32> to vector<8x1xf32>
    %21 = arith.addf %17, %20 : vector<8x1xf32>
    %c0_17 = arith.constant 0 : index
    %c0_18 = arith.constant 0 : index
    %c0_19 = arith.constant 0 : index
    %22 = vector.load %arg6[%c0_17, %c0_18, %c0_19] : memref<1x8x1xf32, #tpu.memory_space<vmem>>, vector<1x8x1xf32>
    %23 = vector.shape_cast %22 : vector<1x8x1xf32> to vector<8x1xf32>
    %24 = vector.shape_cast %21 : vector<8x1xf32> to vector<1x8x1xf32>
    tpu.vector_store %arg6[%c0_17, %c0_18, %c0_19], %24 {strides = array<i32>} : memref<1x8x1xf32, #tpu.memory_space<vmem>>, vector<1x8x1xf32>,
    return
  }
  func.func @transform_0(%arg0: i32, %arg1: i32) -> (i32, i32) {
    %c1_i32 = arith.constant 1 : i32
    %0 = arith.muli %arg0, %c1_i32 : i32
    %1 = arith.addi %0, %arg1 : i32
    %c0_i32 = arith.constant 0 : i32
    %c0_i32_0 = arith.constant 0 : i32
    return %c0_i32, %1 : i32, i32
  }
  func.func @transform_1(%arg0: i32, %arg1: i32) -> (i32, i32) {
    %c0_i32 = arith.constant 0 : i32
    %c0_i32_0 = arith.constant 0 : i32
    %c0_i32_1 = arith.constant 0 : i32
    return %c0_i32, %c0_i32_0 : i32, i32
  }
  func.func @transform_2(%arg0: i32, %arg1: i32) -> (i32, i32) {
    %c1_i32 = arith.constant 1 : i32
    %0 = arith.muli %arg0, %c1_i32 : i32
    %1 = arith.addi %0, %arg1 : i32
    %c0_i32 = arith.constant 0 : i32
    %c0_i32_0 = arith.constant 0 : i32
    return %c0_i32, %1 : i32, i32
  }
  func.func @transform_3(%arg0: i32, %arg1: i32) -> (i32, i32, i32) {
    %c0_i32 = arith.constant 0 : i32
    %c0_i32_0 = arith.constant 0 : i32
    %c0_i32_1 = arith.constant 0 : i32
    return %arg0, %c0_i32, %c0_i32_0 : i32, i32, i32
  }
  func.func @transform_4(%arg0: i32, %arg1: i32) -> (i32, i32, i32) {
    %c0_i32 = arith.constant 0 : i32
    %c0_i32_0 = arith.constant 0 : i32
    %c0_i32_1 = arith.constant 0 : i32
    return %arg0, %c0_i32, %c0_i32_0 : i32, i32, i32
  }
}

</mosaic_0001>

<bundles_post_ra>
// kernel: tpu_custom_call.1
= control target key start
LH: loop header
LB: loop body
LE: loop exit
PB: predicated region body
PF: predicated region fallthrough
CT: control target
= control target key end

     0   :  { %s1001_s0 = inlined_call_operand.hbm [shape: bf16[12,512], index: 0, kind: input, shape index: {}]   ;;  %s1002_s1 = inlined_call_operand.hbm [shape: bf16[8,12], index: 1, kind: input, shape index: {}]   ;;  %s1003_s2 = inlined_call_operand.hbm [shape: bf16[8,512], index: 2, kind: output, shape index: {0}]   ;;  %s1004_s3 = inlined_call_operand.vmem [shape: f32[2,8,1], index: 3, kind: output, shape index: {1}]   ;;  %s1005_s4 = inlined_call_operand.vmem [shape: f32[2,8,1], index: 4, kind: output, shape index: {2}]  }
   0x1   :  { %1009 = sst [smem:[#allocation12_spill]] %s1002_s1 }
   0x2   :  { %10 = vsyncpa [#allocation3], 0 }
   0x3   :  { %12 = vsyncpa [#allocation3 + $0x1], 0 }
   0x4   :  { %13 = vsyncpa [#allocation6], 0 }
   0x5   :  { %14 = vsyncpa [#allocation4], 0 }
   0x6   :  { %16 = vsyncpa [#allocation4 + $0x1], 0  ;;  %s815_s15 = smov 0   ;;  %s817_s16 = smov 0  }
   0x7   :  { %s819_s17 = smov 0   ;;  %s821_s18 = smov 0  }
   0x8   :  { %s823_s19 = smov 0   ;;  %s825_s20 = smov 0  }
   0x9 LB: > { %s534_s21 = sadd.s32 4294967295, %s780_s20   ;;  %s535_s22 = sadd.s32 4294967294, %s780_s20   ;;  %s780_s20 = sphi %s825_s20, %s22_s20   ;;  %s776_s19 = sphi %s823_s19, %s1029_s19   ;;  %s772_s18 = sphi %s821_s18, %s1028_s18   ;;  %s768_s17 = sphi %s819_s17, %s1027_s17   ;;  %s764_s16 = sphi %s817_s16, %s1026_s16   ;;  %s760_s15 = sphi %s815_s15, %s1025_s15  }
   0xa   : > { %s43_s23 = sadd.s32 1, %s768_s17  ;;  %p50_p0 = scmp.ne.s32.totalorder %s768_s17, %s764_s16 }
   0xb   : > { %p51_p1 = scmp.eq.s32.totalorder %s780_s20, 0  ;;  %p56_p2 = scmp.ne.s32.totalorder %s764_s16, %s760_s15 }
   0xc   : > { %p853_p3 = scmp.eq.s32.totalorder %s534_s21, 0  ;;  %p103_p4 = scmp.eq.s32.totalorder %s534_s21, 1 }
   0xd   : > { %p857_p5 = por %p51_p1, %p50_p0  ;;  %p109_p6 = scmp.eq.s32.totalorder %s535_s22, 1 }
   0xe   : > { %p863_p7 = por %p853_p3, %p56_p2  ;;  %p867_p8 = por %p103_p4, %p50_p0 }
   0xf   : > { %p871_p9 = por %p109_p6, %p56_p2  ;;  %p536_p10 = scmp.ge.s32.totalorder %s780_s20, 1 }
  0x10   : > { %s1012_s26 = scalar_select %p863_p7, 1, 0 }
  0x11   : > { %s1013_s27 = scalar_select %p867_p8, 1, 0 }
  0x12   : > { %s1014_s28 = scalar_select %p871_p9, 1, 0 }
  0x13   : > { %p168_p11 = scmp.lt.s32.totalorder %s780_s20, 3  ;;  %s782_s30 = smov [#allocation5]  }
  0x14   : > { %s181_s5 = sshll.u32 %s782_s30, 4  ;;  %p582_p1 = scmp.lt.s32.totalorder %s780_s20, 2  ;;  %s182_s5 = int_to_ptr.vmem [resolvable:$true] %s181_s5 }
  0x15   : > { %p878_p13 = pnand %p536_p10, %p168_p11  ;;  %s34_s8 = sadd.s32 1, %s776_s19 }
  0x16   : > { %p887_p4 = pnand %p582_p1, %p857_p5  ;;  %p36_p6 = scmp.ge.s32.totalorder %s34_s8, 2 }
  0x17   : > { %p569_p0 = pneg %p878_p13  ;;  %s192_s9 = sand.u32 1, %s768_s17  }
  0x18   : > { %s653_s10 = scalar_lea.vmem %s182_s5, 64  ;;  %p661_p8 = scmp.lt.s32.totalorder %s182_s5, %s182_s5 }
  0x19   : > { %p893_p2 = pnand %p569_p0, %p853_p3  ;;  %p654_p11 = scmp.ne.s32.totalorder %s182_s5, %s653_s10 }
  0x1a   : > { %p662_p5 = scmp.lt.s32.totalorder %s653_s10, %s653_s10 }
  0x1b   : > { %p644_p10 = pneg %p893_p2 }
  0x1c   : > { %p663_p1 = por %p662_p5, %p661_p8 }
  0x1d   : > { %p656_p12 = pnand %p654_p11, %p644_p10 }
  0x1f   : > { %p657_p9 = pneg %p656_p12 }
  0x21   : > { %p664_p7 = pnand %p663_p1, %p657_p9 }
  0x23   : > { %667 = shalt.err (!%p664_p7)
}
  0x24   : > { %s1018_s1 = sld [smem:[#allocation12_spill]]  ;;  %s1031_s8 = smov (%p36_p6, %s34_s8), 0 }
  0x25   : > { %1019 = sst [smem:[#allocation11_spill]] %s1031_s8  ;;  %s539_s13 = sshll.u32 %s192_s9, 4 }
  0x26   : > { %s40_s14 = ssub.s32 %s776_s19, %s1031_s8  ;;  %s558_s21 = sshll.u32 %s776_s19, 7 }
  0x27   : > { %p41_p12 = scmp.eq.s32.totalorder %s40_s14, 0  ;;  %s203_s30 = scalar_lea.hbm %s1001_s0, %s558_s21 }
  0x28   : > { %s196_s7 = scalar_lea.vmem [#allocation2], %s539_s13  ;;  %s193_s12 = scalar_lea.sflag [#allocation3], %s192_s9 }
  0x29   : > { %s204_s10 = sshll.u32 %s196_s7, 4  ;;  %p670_p7 = pneg %p887_p4  ;;  %s205_s10 = int_to_ptr.vmem [resolvable:$true] %s204_s10 }
  0x2a   : > { %572 = dma.hbm_to_vmem [thread:$0]  (!%p893_p2), %s1018_s1, 64, %s182_s5, [#allocation6]  }
  0x2b   : > { %s917_s11 = scalar_select %p41_p12, %s768_s17, %s43_s23  }
  0x2c   : > { %s681_s5 = scalar_lea.vmem %s205_s10, 256  ;;  %s783_s1 = smov [#allocation2]  }
  0x2d   : > { %p682_p8 = scmp.ne.s32.totalorder %s205_s10, %s681_s5  ;;  %s686_s14 = sshll.u32 %s783_s1, 4  ;;  %s687_s14 = int_to_ptr.vmem [resolvable:$false] %s686_s14 }
  0x2e   : > { %s688_s8 = scalar_lea.vmem %s687_s14, 512  ;;  %p689_p2 = scmp.lt.s32.totalorder %s205_s10, %s687_s14 }
  0x2f   : > { %p684_p9 = pnand %p682_p8, %p670_p7  ;;  %p690_p6 = scmp.lt.s32.totalorder %s688_s8, %s681_s5 }
  0x31   : > { %p685_p0 = pneg %p684_p9  ;;  %p691_p10 = por %p690_p6, %p689_p2 }
  0x33   : > { %p692_p11 = pnand %p691_p10, %p685_p0 }
  0x35   : > { %695 = shalt.err (!%p692_p11)
}
  0x36   : > { %s784_s13 = smov 256   ;;  %s785_s23 = smov 128  }
  0x37   : > { %s786_s21 = smov 8   ;;  %216 = sbr.rel (%p878_p13) target bundleno = 411 (0x19b), region = 28 }
  0x38   : > { %576 = dma.hbm_to_vmem [thread:$0]  (!%p887_p4), %s203_s30, 256, %s205_s10, %s193_s12, %s784_s13, %s785_s23, %s786_s21  }
  0x39   : > { %s926_s9 = sand.u32 (!%p878_p13), 1, %s764_s16   ;;  %p1020_p5 = scmp.ne.s32.totalorder (!%p878_p13), %s1012_s26, 0 }
  0x3a   : > { %s543_s1 = sshll.u32 (!%p878_p13), %s926_s9, 4  ;;  %s219_s8 = scalar_lea.sflag (!%p878_p13), [#allocation3], %s926_s9 }
  0x3b   : > { %s222_s22 = scalar_lea.vmem (!%p878_p13), [#allocation2], %s543_s1 }
  0x3c   : > { %747 = dma.done.wait (%p1020_p5), %s219_s8, 256  }
  0x3d   : > { %749 = vsyncadd (%p1020_p5), %s219_s8, 4294967040 }
  0x3e   : > { %751 = dma.done.wait (%p853_p3), [#allocation6], 64  }
  0x3f   : > { %753 = vsyncadd (%p853_p3), [#allocation6], 4294967232  ;;  %v787_v0 = vmov 0   ;;  %vm287_vm0 = vcmask 1045504   ;;  %v272_v4 = vld [vmem:[#allocation5] sm:$0xf] }
  0x40   : > { %326 = vmatprep.mubr.bf16.mxu0 %v787_v0  ;;  %v639_v1 = vld [vmem:[%s222_s22 + $0x4] ss:$8 sps:$4 sm:$0x3f]   ;;  %v641_v2 = vld [vmem:[%s222_s22] ss:$8 sps:$4 sm:$0x3f]  }
  0x41   : > { %550 = vmatprep.subr.msk.bf16.mxu0 %vm287_vm0, %v639_v1  ;;  %v289_v3 = vsel %vm287_vm0, %v641_v2, 0  ;;  %vm283_vm1 = vcmask 97280   ;;  %p263_p13 = scmp.lt.s32.totalorder %s772_s18, 1  ;;  %vm348_vm2 = vcmask 7168   ;;  %v788_v5 = vmov 0.0   ;;  %s545_s30 = sshll.u32 %s926_s9, 3 }
  0x42   : > { %309 = vmatpush1.bf16.msra.mxu0 %v289_v3  ;;  %s246_s7 = scalar_lea.vmem [#allocation7], %s545_s30  ;;  %s560_s14 = sshll.u32 %s772_s18, 7 }
  0x43   : > { %s264_s26 = scalar_select %p263_p13, %s772_s18, 1 }
  0x44   : > { %s390_s13 = sshll.u32 %s246_s7, 4  ;;  %s388_s1 = scalar_lea.hbm %s1003_s2, %s560_s14  ;;  %s391_s13 = int_to_ptr.vmem [resolvable:$true] %s390_s13 }
  0x45   : > { %551 = vmatmul.mubr.msk.bf16.vlgmr.msra.gmra.mxu0 %vm283_vm1, %v272_v4  ;;  %s546_s29 = sshll.u32 %s264_s26, 3  ;;  %s367_s8 = scalar_lea.sflag [#allocation4], %s926_s9 }
  0x46   : > { %s943_s25 = scalar_lea.vmem %s1004_s3, %s546_s29  ;;  %s951_s5 = scalar_lea.vmem %s1005_s4, %s546_s29 }
  0x47   : > { %349 = vst.msk [vmem:[%s943_s25] sm:$0xff] %vm348_vm2, %v788_v5  ;;  %350 = vst.msk [vmem:[%s951_s5] sm:$0xff] %vm348_vm2, %v788_v5  ;;  %s696_s22 = scalar_lea.vmem %s391_s13, 128  ;;  %p1021_p4 = scmp.ne.s32.totalorder %s1013_s27, 0 }
  0x48   : > { %p697_p3 = scmp.ne.s32.totalorder %s391_s13, %s696_s22  ;;  %s789_s26 = smov [#allocation7]  }
  0x49   : > { %s700_s24 = sshll.u32 %s789_s26, 4  ;;  %s701_s24 = int_to_ptr.vmem [resolvable:$false] %s700_s24 }
  0x4a   : > { %p698_p1 = pnand %p697_p3, %p1021_p4  ;;  %s702_s29 = scalar_lea.vmem %s701_s24, 256 }
  0x4b   : > { %p703_p7 = scmp.lt.s32.totalorder %s391_s13, %s701_s24  ;;  %p704_p8 = scmp.lt.s32.totalorder %s702_s29, %s696_s22 }
  0x4c   : > { %p699_p12 = pneg %p698_p1 }
  0x4d   : > { %p705_p9 = por %p704_p8, %p703_p7 }
  0x4f   : > { %p706_p0 = pnand %p705_p9, %p699_p12 }
 0x105   : > { %v328_v6 = vpop.f32.mrf.mxu0 }
 0x106   : > { %v359_v12 = vmul.f32 %v328_v6, %v328_v6 }
 0x107   : > { %v330_v7 = vpop.f32.mrf.mxu0 }
 0x108   : > { %v559_v8 = vpack.c.bf16 %v330_v7, %v328_v6  ;;  %v352_v9 = vadd.f32 %v330_v7, %v328_v6  ;;  %v360_v10 = vmul.f32 %v330_v7, %v330_v7 }
 0x109   : > { %v332_v11 = vpop.f32.mrf.mxu0 }
 0x10a   : > { %353 = vadd.xlane.f32.xlu0 %v352_v9  ;;  %343 = vst [vmem:[%s246_s7] sm:$0xff] %v559_v8  ;;  %v361_v14 = vadd.f32 %v360_v10, %v359_v12 }
 0x10b   : > { %v333_v13 = vpop.f32.mrf.mxu0 }
 0x10e   : > { %362 = vadd.xlane.f32.xlu0 %v361_v14 }
 0x10f   : > { %709 = shalt.err (!%p706_p0)
}
 0x110   : > { %s710_s18 = scalar_lea.hbm %s388_s1, 128  ;;  %s714_s30 = scalar_lea.hbm %s1003_s2, 256 }
 0x111   : > { %p711_p2 = scmp.ne.s32.totalorder %s388_s1, %s710_s18  ;;  %p715_p11 = scmp.lt.s32.totalorder %s388_s1, %s1003_s2 }
 0x112   : > { %p716_p5 = scmp.lt.s32.totalorder %s714_s30, %s710_s18 }
 0x113   : > { %p712_p6 = pnand %p711_p2, %p1021_p4 }
 0x114   : > { %p717_p13 = por %p716_p5, %p715_p11 }
 0x115   : > { %p713_p10 = pneg %p712_p6 }
 0x117   : > { %p718_p3 = pnand %p717_p13, %p713_p10 }
 0x119   : > { %721 = shalt.err (!%p718_p3)
}
 0x11a   : > { %567 = dma.vmem_to_hbm [thread:$0]  (%p1021_p4), %s391_s13, 128, %s388_s1, %s367_s8   ;;  %v351_v15 = vld [vmem:[%s943_s25] sm:$0xff] }
 0x11b   : > { %v358_v18 = vld [vmem:[%s951_s5] sm:$0xff] }
 0x193   : > { %v354_v16 = vpop.xlane.xlu0 %353 }
 0x194   : > { %v355_v17 = vadd.f32 %v354_v16, %v351_v15 }
 0x196   : > { %357 = vst.msk [vmem:[%s943_s25] sm:$0xff] %vm348_vm2, %v355_v17 }
 0x197   : > { %v363_v19 = vpop.xlane.xlu0 %362 }
 0x198   : > { %v364_v20 = vadd.f32 %v363_v19, %v358_v18 }
 0x19a   : > { %365 = vst.msk [vmem:[%s951_s5] sm:$0xff] %vm348_vm2, %v364_v20 }
 0x19b PF: > { %s408_s27 = sand.u32 1, %s760_s15   ;;  %p1022_p1 = scmp.ne.s32.totalorder %s1014_s28, 0 }
 0x19c   : > { %p1023_p12 = scmp.ge.s32.totalorder %s780_s20, 2  ;;  %s409_s12 = scalar_lea.sflag [#allocation4], %s408_s27 }
 0x19e   : > { %p578_p7 = pnand %p1023_p12, %p1022_p1 }
 0x1a0   : > { %p579_p8 = pneg %p578_p7 }
 0x1a2   : > { %755 = dma.done.wait (%p579_p8), %s409_s12, 128  }
 0x1a3   : > { %757 = vsyncadd (%p579_p8), %s409_s12, 4294967168  ;;  %s22_s20 = sadd.s32 1, %s780_s20   ;;  %s1024_s25 = sld [smem:[#allocation11_spill]] }
 0x1a4   : > { %p19_p4 = scmp.ge.s32.totalorder %s22_s20, 4   ;;  %s1025_s15 = smov %s764_s16 }
 0x1a5   : > { %s1026_s16 = smov %s768_s17  ;;  %s1027_s17 = smov %s917_s11 }
 0x1a6   : > { %s1028_s18 = smov %s776_s19  ;;  %21 = sbr.rel (!%p19_p4) target bundleno = 9 (0x9), region = 105 }
 0x1a9   : > { %s1029_s19 = smov %s1024_s25 }
 0x1ab   :  { %428 = vsyncpa [#allocation3], 1 }
 0x1ac   :  { %430 = vsyncpa [#allocation3 + $0x1], 1 }
 0x1ad   :  { %431 = vsyncpa [#allocation6], 1 }
 0x1ae   :  { %432 = vsyncpa [#allocation4], 1 }
 0x1af   :  { %434 = vsyncpa [#allocation4 + $0x1], 1 }

</bundles_post_ra>
